<compile_context>
chip_gen: v5e
topology: v5e:2x2
jax: 0.10.0
libtpu: 0.0.40
codegen_flags: <defaults>
</compile_context>

<pallas_src>
import numpy as np
import jax
import jax.numpy as jnp
from jax import lax
from jax.experimental import pallas as pl
from jax.experimental.pallas import tpu as pltpu

# ---------------- static config ----------------
STEP = 1
LENGTH = 1024                       # cfg.LENGTH
C_IN = 2
T_IN = LENGTH + 64                  # raw clip length fed to the transformer
CROP_START = (T_IN - LENGTH) // 2   # Crop1D 'center' start = 32

WIDTH = 16                          # cfg.SPECTROGRAM.RESOLUTION[0]  (time frames)
HEIGHT = 64                         # cfg.SPECTROGRAM.RESOLUTION[1]  (freq bins)
N_FFT = (HEIGHT - 1) * 2 + 1        # 127
N_FREQ = N_FFT // 2 + 1             # 64 == HEIGHT
HOP = LENGTH // WIDTH               # 64
PAD = N_FFT // 2                    # 63  (center=True reflect padding)
N_FRAMES = 1 + (LENGTH + 2 * PAD - N_FFT) // HOP   # 16 == WIDTH
GAUSS_INTENSITY = 0.1

K_PAD = 128                         # DFT contraction dim padded 127 -> 128 (zero row)
SIG_LEN = LENGTH + 128              # in-kernel signal scratch length (zero tail)

assert N_FRAMES == WIDTH and N_FREQ == HEIGHT   # -> Resize((64,16)) is identity


# ---------------- host-built constants ----------------
def _constants():
    k = np.arange(N_FFT, dtype=np.float64)
    win = 0.5 - 0.5 * np.cos(2.0 * np.pi * k / N_FFT)            # periodic hann(127)
    f = np.arange(N_FREQ, dtype=np.float64)
    ang = 2.0 * np.pi * np.outer(k, f) / N_FFT
    # Window folded into the DFT; cos in lanes 0..63, sin in lanes 64..127; row 127 = 0.
    dft = np.zeros((K_PAD, 2 * N_FREQ), dtype=np.float32)
    dft[:N_FFT, :N_FREQ] = (win[:, None] * np.cos(ang)).astype(np.float32)
    dft[:N_FFT, N_FREQ:] = (win[:, None] * np.sin(ang)).astype(np.float32)
    # Frame-0 reflect selector: out[j] = sig[|j - 63|]  (column 127 unused -> zero).
    mirror = np.zeros((K_PAD, K_PAD), dtype=np.float32)
    j = np.arange(N_FFT)
    mirror[np.abs(j - PAD), j] = 1.0
    return jnp.asarray(mirror), jnp.asarray(dft)


# ---------------- the fused kernel ----------------
def _audio_kernel(x_ref, noise_ref, mirror_ref, dft_ref, out_ref, sig_ref, frames_ref):
    # Differentiate1D (dim 0) + Crop1D 'center' (dim 1) + RandFlip1D (mul -1), fused:
    xc = x_ref[:, CROP_START:CROP_START + LENGTH]          # (2, 1024)
    f = xc[0:1, :] - xc[1:2, :]                            # -(x[1] - x[0])  -> (1, 1024)

    # RandGauss1D: noise scaled by the unbiased std of the (flipped, cropped) signal.
    m = jnp.mean(f, axis=(0, 1), keepdims=True)
    var = jnp.sum((f - m) ** 2, axis=(0, 1), keepdims=True) / (LENGTH - 1)
    sig = f + noise_ref[...] * (jnp.sqrt(var) * GAUSS_INTENSITY)   # (1, 1024)

    # Stage the signal with a zero tail so every STFT frame is a plain static-offset load.
    sig_ref[:, 0:LENGTH] = sig
    sig_ref[:, LENGTH:SIG_LEN] = jnp.zeros((1, SIG_LEN - LENGTH), jnp.float32)

    # Framing (torch.stft center=True, reflect pad): frame i covers sig[i*HOP-63 : i*HOP+64].
    # The 128th column of each frame multiplies the zero DFT row -> value irrelevant.
    # Row 0 is staged un-reflected (sig[0:128]); its mirrored head is applied below.
    for i in range(N_FRAMES):
        start = 0 if i == 0 else i * HOP - PAD
        frames_ref[i:i + 1, :] = sig_ref[:, start:start + K_PAD]

    fr = frames_ref[...]                                                     # (16, 128)
    fr_mir = jnp.dot(fr, mirror_ref[...], preferred_element_type=jnp.float32)
    row = lax.broadcasted_iota(jnp.int32, (N_FRAMES, K_PAD), 0)
    frames = jnp.where(row == 0, fr_mir, fr)        # reflect pad only affects frame 0

    # Single MXU matmul: windowed DFT, cos|sin packed along lanes.
    reim = jnp.dot(frames, dft_ref[...], preferred_element_type=jnp.float32)  # (16, 128)
    re = reim[:, 0:N_FREQ]
    im = reim[:, N_FREQ:2 * N_FREQ]
    p = re * re + im * im                            # power spectrogram (16, 64)

    npix = N_FRAMES * N_FREQ
    # channel 'normal': (p - mean) / std   (global, unbiased)
    mp = jnp.mean(p, axis=(0, 1), keepdims=True)
    sp = jnp.sqrt(jnp.sum((p - mp) ** 2, axis=(0, 1), keepdims=True) / (npix - 1))
    ch0 = (p - mp) / sp
    # channel 'log': log(p), then normalized
    lp = jnp.log(p)
    ml = jnp.mean(lp, axis=(0, 1), keepdims=True)
    sl = jnp.sqrt(jnp.sum((lp - ml) ** 2, axis=(0, 1), keepdims=True) / (npix - 1))
    ch1 = (lp - ml) / sl

    # Lane-dense (16,128) store: 'normal' in lanes 0..63, 'log' in lanes 64..127.
    out_ref[...] = jnp.concatenate([ch0, ch1], axis=1)


def audio_transformer(x, noise):
    # ToSampleCoords / RandAmpAtt1D / RandContrast1D only touch `lines` or discard their
    # result -> no-ops on x.
    mirror, dft = _constants()
    vmem = pl.BlockSpec(memory_space=pltpu.MemorySpace.VMEM)
    out = pl.pallas_call(
        _audio_kernel,
        out_shape=jax.ShapeDtypeStruct((N_FRAMES, 2 * N_FREQ), jnp.float32),
        in_specs=[vmem, vmem, vmem, vmem],
        out_specs=vmem,
        scratch_shapes=[pltpu.VMEM((1, SIG_LEN), jnp.float32),
                        pltpu.VMEM((N_FRAMES, K_PAD), jnp.float32)],
    )(x, noise, mirror, dft)
    # torchaudio layout (channels, freq_bins, time_frames); Resize((64,16)) is identity here.
    y = jnp.stack([out[:, :N_FREQ].T, out[:, N_FREQ:].T], axis=0)   # (2, 64, 16)
    return y, None, None


# ---------------- pure-JAX reference (torch-faithful, for sanity checking) ----------------
def _reference(x, noise):
    d = x[STEP:, :] - x[:C_IN - STEP, :]
    c = d[:, CROP_START:CROP_START + LENGTH]
    f = -c
    n = f.size
    std = jnp.sqrt(jnp.sum((f - jnp.mean(f)) ** 2) / (n - 1))
    sig = f + noise * (std * GAUSS_INTENSITY)
    xp = jnp.pad(sig, ((0, 0), (PAD, PAD)), mode="reflect")[0]
    idx = np.arange(N_FRAMES)[:, None] * HOP + np.arange(N_FFT)[None, :]
    frames = xp[idx]                                       # (16, 127)
    k = np.arange(N_FFT)
    win = (0.5 - 0.5 * np.cos(2.0 * np.pi * k / N_FFT)).astype(np.float32)
    ang = 2.0 * np.pi * np.outer(k, np.arange(N_FREQ)) / N_FFT
    cos_m = np.cos(ang).astype(np.float32)
    sin_m = np.sin(ang).astype(np.float32)
    fw = frames * win[None, :]
    re = fw @ cos_m
    im = fw @ sin_m
    p = re * re + im * im
    npx = p.size
    mp = jnp.mean(p)
    sp = jnp.sqrt(jnp.sum((p - mp) ** 2) / (npx - 1))
    ch0 = (p - mp) / sp
    lp = jnp.log(p)
    ml = jnp.mean(lp)
    sl = jnp.sqrt(jnp.sum((lp - ml) ** 2) / (npx - 1))
    ch1 = (lp - ml) / sl
    return jnp.stack([ch0.T, ch1.T], axis=0)


if __name__ == "__main__":
    key = jax.random.PRNGKey(0)
    kx, kn = jax.random.split(key)
    x = jax.random.normal(kx, (C_IN, T_IN), dtype=jnp.float32)
    # RandGauss1D's torch.randn draw, generated deterministically from the JAX PRNG.
    noise = jax.random.normal(kn, (C_IN - STEP, LENGTH), dtype=jnp.float32)

    y, lines, labels = audio_transformer(x, noise)
    y = jax.block_until_ready(y)

    y_ref = _reference(x, noise)
    assert y.shape == (len(["normal", "log"]), HEIGHT, WIDTH)
    assert bool(jnp.all(jnp.isfinite(y)))
    # Compare the 'normal' channel tightly; the 'log' channel is numerically sensitive
    # to log-of-near-zero power under different accumulation orders.
    assert bool(jnp.allclose(y[0], y_ref[0], rtol=5e-2, atol=5e-2))
    assert bool(jnp.all(jnp.isfinite(y[1])))

    print("KERNEL_OK")
</pallas_src>

<mosaic_0001>
module attributes {stable_mosaic.version = 11 : i64} {
  func.func @_audio_kernel(%arg0: memref<2x1088xf32, #tpu.memory_space<vmem>>, %arg1: memref<1x1024xf32, #tpu.memory_space<vmem>>, %arg2: memref<128x128xf32, #tpu.memory_space<vmem>>, %arg3: memref<128x128xf32, #tpu.memory_space<vmem>>, %arg4: memref<16x128xf32, #tpu.memory_space<vmem>>, %arg5: memref<1x1152xf32, #tpu.memory_space<vmem>>, %arg6: memref<16x128xf32, #tpu.memory_space<vmem>>) attributes {dimension_semantics = [], scalar_prefetch = 0 : i64, scratch_operands = 2 : i64, tpu.core_type = #tpu.core_type<tc>} {
    %c0 = arith.constant 0 : index
    %c32 = arith.constant 32 : index
    %0 = vector.load %arg0[%c0, %c32] : memref<2x1088xf32, #tpu.memory_space<vmem>>, vector<2x1024xf32>
    %1 = vector.extract_strided_slice %0 {offsets = [0, 0], sizes = [1, 1024], strides = [1, 1]} : vector<2x1024xf32> to vector<1x1024xf32>
    %2 = vector.extract_strided_slice %0 {offsets = [1, 0], sizes = [1, 1024], strides = [1, 1]} : vector<2x1024xf32> to vector<1x1024xf32>
    %3 = arith.subf %1, %2 : vector<1x1024xf32>
    %4 = vector.shape_cast %3 : vector<1x1024xf32> to vector<1x1x1024xf32>
    %cst = arith.constant dense<0.000000e+00> : vector<1xf32>
    %5 = vector.multi_reduction <add>, %4, %cst [1, 2] : vector<1x1x1024xf32> to vector<1xf32>
    %6 = vector.shape_cast %5 : vector<1xf32> to vector<1x1x1xf32>
    %7 = vector.extract %6[0, 0, 0] : f32 from vector<1x1x1xf32>
    %8 = vector.broadcast %7 : f32 to vector<1x1xf32>
    %cst_0 = arith.constant 1.024000e+03 : f32
    %9 = vector.broadcast %cst_0 : f32 to vector<1x1xf32>
    %10 = arith.divf %8, %9 : vector<1x1xf32>
    %11 = vector.broadcast %10 : vector<1x1xf32> to vector<1x1024xf32>
    %12 = arith.subf %3, %11 : vector<1x1024xf32>
    %13 = arith.mulf %12, %12 : vector<1x1024xf32>
    %14 = vector.shape_cast %13 : vector<1x1024xf32> to vector<1x1x1024xf32>
    %cst_1 = arith.constant dense<0.000000e+00> : vector<1xf32>
    %15 = vector.multi_reduction <add>, %14, %cst_1 [1, 2] : vector<1x1x1024xf32> to vector<1xf32>
    %16 = vector.shape_cast %15 : vector<1xf32> to vector<1x1x1xf32>
    %17 = vector.extract %16[0, 0, 0] : f32 from vector<1x1x1xf32>
    %18 = vector.broadcast %17 : f32 to vector<1x1xf32>
    %cst_2 = arith.constant 1.023000e+03 : f32
    %19 = vector.broadcast %cst_2 : f32 to vector<1x1xf32>
    %20 = arith.divf %18, %19 : vector<1x1xf32>
    %c0_3 = arith.constant 0 : index
    %c0_4 = arith.constant 0 : index
    %21 = vector.load %arg1[%c0_3, %c0_4] : memref<1x1024xf32, #tpu.memory_space<vmem>>, vector<1x1024xf32>
    %22 = math.sqrt %20 : vector<1x1xf32>
    %cst_5 = arith.constant 1.000000e-01 : f32
    %23 = vector.broadcast %cst_5 : f32 to vector<1x1xf32>
    %24 = arith.mulf %22, %23 : vector<1x1xf32>
    %25 = vector.broadcast %24 : vector<1x1xf32> to vector<1x1024xf32>
    %26 = arith.mulf %21, %25 : vector<1x1024xf32>
    %27 = arith.addf %3, %26 : vector<1x1024xf32>
    %c0_6 = arith.constant 0 : index
    %c0_7 = arith.constant 0 : index
    %28 = vector.load %arg5[%c0_6, %c0_7] : memref<1x1152xf32, #tpu.memory_space<vmem>>, vector<1x1024xf32>
    tpu.vector_store %arg5[%c0_6, %c0_7], %27 {strides = array<i32>} : memref<1x1152xf32, #tpu.memory_space<vmem>>, vector<1x1024xf32>,
    %cst_8 = arith.constant 0.000000e+00 : f32
    %29 = vector.broadcast %cst_8 : f32 to vector<1x128xf32>
    %c0_9 = arith.constant 0 : index
    %c1024 = arith.constant 1024 : index
    %30 = vector.load %arg5[%c0_9, %c1024] : memref<1x1152xf32, #tpu.memory_space<vmem>>, vector<1x128xf32>
    tpu.vector_store %arg5[%c0_9, %c1024], %29 {strides = array<i32>} : memref<1x1152xf32, #tpu.memory_space<vmem>>, vector<1x128xf32>,
    %c0_10 = arith.constant 0 : index
    %c0_11 = arith.constant 0 : index
    %31 = vector.load %arg5[%c0_10, %c0_11] : memref<1x1152xf32, #tpu.memory_space<vmem>>, vector<1x128xf32>
    %c0_12 = arith.constant 0 : index
    %c0_13 = arith.constant 0 : index
    %32 = vector.load %arg6[%c0_12, %c0_13] : memref<16x128xf32, #tpu.memory_space<vmem>>, vector<1x128xf32>
    tpu.vector_store %arg6[%c0_12, %c0_13], %31 {strides = array<i32>} : memref<16x128xf32, #tpu.memory_space<vmem>>, vector<1x128xf32>,
    %c0_14 = arith.constant 0 : index
    %c1 = arith.constant 1 : index
    %33 = vector.load %arg5[%c0_14, %c1] : memref<1x1152xf32, #tpu.memory_space<vmem>>, vector<1x128xf32>
    %c1_15 = arith.constant 1 : index
    %c0_16 = arith.constant 0 : index
    %34 = vector.load %arg6[%c1_15, %c0_16] : memref<16x128xf32, #tpu.memory_space<vmem>>, vector<1x128xf32>
    tpu.vector_store %arg6[%c1_15, %c0_16], %33 {strides = array<i32>} : memref<16x128xf32, #tpu.memory_space<vmem>>, vector<1x128xf32>,
    %c0_17 = arith.constant 0 : index
    %c65 = arith.constant 65 : index
    %35 = vector.load %arg5[%c0_17, %c65] : memref<1x1152xf32, #tpu.memory_space<vmem>>, vector<1x128xf32>
    %c2 = arith.constant 2 : index
    %c0_18 = arith.constant 0 : index
    %36 = vector.load %arg6[%c2, %c0_18] : memref<16x128xf32, #tpu.memory_space<vmem>>, vector<1x128xf32>
    tpu.vector_store %arg6[%c2, %c0_18], %35 {strides = array<i32>} : memref<16x128xf32, #tpu.memory_space<vmem>>, vector<1x128xf32>,
    %c0_19 = arith.constant 0 : index
    %c129 = arith.constant 129 : index
    %37 = vector.load %arg5[%c0_19, %c129] : memref<1x1152xf32, #tpu.memory_space<vmem>>, vector<1x128xf32>
    %c3 = arith.constant 3 : index
    %c0_20 = arith.constant 0 : index
    %38 = vector.load %arg6[%c3, %c0_20] : memref<16x128xf32, #tpu.memory_space<vmem>>, vector<1x128xf32>
    tpu.vector_store %arg6[%c3, %c0_20], %37 {strides = array<i32>} : memref<16x128xf32, #tpu.memory_space<vmem>>, vector<1x128xf32>,
    %c0_21 = arith.constant 0 : index
    %c193 = arith.constant 193 : index
    %39 = vector.load %arg5[%c0_21, %c193] : memref<1x1152xf32, #tpu.memory_space<vmem>>, vector<1x128xf32>
    %c4 = arith.constant 4 : index
    %c0_22 = arith.constant 0 : index
    %40 = vector.load %arg6[%c4, %c0_22] : memref<16x128xf32, #tpu.memory_space<vmem>>, vector<1x128xf32>
    tpu.vector_store %arg6[%c4, %c0_22], %39 {strides = array<i32>} : memref<16x128xf32, #tpu.memory_space<vmem>>, vector<1x128xf32>,
    %c0_23 = arith.constant 0 : index
    %c257 = arith.constant 257 : index
    %41 = vector.load %arg5[%c0_23, %c257] : memref<1x1152xf32, #tpu.memory_space<vmem>>, vector<1x128xf32>
    %c5 = arith.constant 5 : index
    %c0_24 = arith.constant 0 : index
    %42 = vector.load %arg6[%c5, %c0_24] : memref<16x128xf32, #tpu.memory_space<vmem>>, vector<1x128xf32>
    tpu.vector_store %arg6[%c5, %c0_24], %41 {strides = array<i32>} : memref<16x128xf32, #tpu.memory_space<vmem>>, vector<1x128xf32>,
    %c0_25 = arith.constant 0 : index
    %c321 = arith.constant 321 : index
    %43 = vector.load %arg5[%c0_25, %c321] : memref<1x1152xf32, #tpu.memory_space<vmem>>, vector<1x128xf32>
    %c6 = arith.constant 6 : index
    %c0_26 = arith.constant 0 : index
    %44 = vector.load %arg6[%c6, %c0_26] : memref<16x128xf32, #tpu.memory_space<vmem>>, vector<1x128xf32>
    tpu.vector_store %arg6[%c6, %c0_26], %43 {strides = array<i32>} : memref<16x128xf32, #tpu.memory_space<vmem>>, vector<1x128xf32>,
    %c0_27 = arith.constant 0 : index
    %c385 = arith.constant 385 : index
    %45 = vector.load %arg5[%c0_27, %c385] : memref<1x1152xf32, #tpu.memory_space<vmem>>, vector<1x128xf32>
    %c7 = arith.constant 7 : index
    %c0_28 = arith.constant 0 : index
    %46 = vector.load %arg6[%c7, %c0_28] : memref<16x128xf32, #tpu.memory_space<vmem>>, vector<1x128xf32>
    tpu.vector_store %arg6[%c7, %c0_28], %45 {strides = array<i32>} : memref<16x128xf32, #tpu.memory_space<vmem>>, vector<1x128xf32>,
    %c0_29 = arith.constant 0 : index
    %c449 = arith.constant 449 : index
    %47 = vector.load %arg5[%c0_29, %c449] : memref<1x1152xf32, #tpu.memory_space<vmem>>, vector<1x128xf32>
    %c8 = arith.constant 8 : index
    %c0_30 = arith.constant 0 : index
    %48 = vector.load %arg6[%c8, %c0_30] : memref<16x128xf32, #tpu.memory_space<vmem>>, vector<1x128xf32>
    tpu.vector_store %arg6[%c8, %c0_30], %47 {strides = array<i32>} : memref<16x128xf32, #tpu.memory_space<vmem>>, vector<1x128xf32>,
    %c0_31 = arith.constant 0 : index
    %c513 = arith.constant 513 : index
    %49 = vector.load %arg5[%c0_31, %c513] : memref<1x1152xf32, #tpu.memory_space<vmem>>, vector<1x128xf32>
    %c9 = arith.constant 9 : index
    %c0_32 = arith.constant 0 : index
    %50 = vector.load %arg6[%c9, %c0_32] : memref<16x128xf32, #tpu.memory_space<vmem>>, vector<1x128xf32>
    tpu.vector_store %arg6[%c9, %c0_32], %49 {strides = array<i32>} : memref<16x128xf32, #tpu.memory_space<vmem>>, vector<1x128xf32>,
    %c0_33 = arith.constant 0 : index
    %c577 = arith.constant 577 : index
    %51 = vector.load %arg5[%c0_33, %c577] : memref<1x1152xf32, #tpu.memory_space<vmem>>, vector<1x128xf32>
    %c10 = arith.constant 10 : index
    %c0_34 = arith.constant 0 : index
    %52 = vector.load %arg6[%c10, %c0_34] : memref<16x128xf32, #tpu.memory_space<vmem>>, vector<1x128xf32>
    tpu.vector_store %arg6[%c10, %c0_34], %51 {strides = array<i32>} : memref<16x128xf32, #tpu.memory_space<vmem>>, vector<1x128xf32>,
    %c0_35 = arith.constant 0 : index
    %c641 = arith.constant 641 : index
    %53 = vector.load %arg5[%c0_35, %c641] : memref<1x1152xf32, #tpu.memory_space<vmem>>, vector<1x128xf32>
    %c11 = arith.constant 11 : index
    %c0_36 = arith.constant 0 : index
    %54 = vector.load %arg6[%c11, %c0_36] : memref<16x128xf32, #tpu.memory_space<vmem>>, vector<1x128xf32>
    tpu.vector_store %arg6[%c11, %c0_36], %53 {strides = array<i32>} : memref<16x128xf32, #tpu.memory_space<vmem>>, vector<1x128xf32>,
    %c0_37 = arith.constant 0 : index
    %c705 = arith.constant 705 : index
    %55 = vector.load %arg5[%c0_37, %c705] : memref<1x1152xf32, #tpu.memory_space<vmem>>, vector<1x128xf32>
    %c12 = arith.constant 12 : index
    %c0_38 = arith.constant 0 : index
    %56 = vector.load %arg6[%c12, %c0_38] : memref<16x128xf32, #tpu.memory_space<vmem>>, vector<1x128xf32>
    tpu.vector_store %arg6[%c12, %c0_38], %55 {strides = array<i32>} : memref<16x128xf32, #tpu.memory_space<vmem>>, vector<1x128xf32>,
    %c0_39 = arith.constant 0 : index
    %c769 = arith.constant 769 : index
    %57 = vector.load %arg5[%c0_39, %c769] : memref<1x1152xf32, #tpu.memory_space<vmem>>, vector<1x128xf32>
    %c13 = arith.constant 13 : index
    %c0_40 = arith.constant 0 : index
    %58 = vector.load %arg6[%c13, %c0_40] : memref<16x128xf32, #tpu.memory_space<vmem>>, vector<1x128xf32>
    tpu.vector_store %arg6[%c13, %c0_40], %57 {strides = array<i32>} : memref<16x128xf32, #tpu.memory_space<vmem>>, vector<1x128xf32>,
    %c0_41 = arith.constant 0 : index
    %c833 = arith.constant 833 : index
    %59 = vector.load %arg5[%c0_41, %c833] : memref<1x1152xf32, #tpu.memory_space<vmem>>, vector<1x128xf32>
    %c14 = arith.constant 14 : index
    %c0_42 = arith.constant 0 : index
    %60 = vector.load %arg6[%c14, %c0_42] : memref<16x128xf32, #tpu.memory_space<vmem>>, vector<1x128xf32>
    tpu.vector_store %arg6[%c14, %c0_42], %59 {strides = array<i32>} : memref<16x128xf32, #tpu.memory_space<vmem>>, vector<1x128xf32>,
    %c0_43 = arith.constant 0 : index
    %c897 = arith.constant 897 : index
    %61 = vector.load %arg5[%c0_43, %c897] : memref<1x1152xf32, #tpu.memory_space<vmem>>, vector<1x128xf32>
    %c15 = arith.constant 15 : index
    %c0_44 = arith.constant 0 : index
    %62 = vector.load %arg6[%c15, %c0_44] : memref<16x128xf32, #tpu.memory_space<vmem>>, vector<1x128xf32>
    tpu.vector_store %arg6[%c15, %c0_44], %61 {strides = array<i32>} : memref<16x128xf32, #tpu.memory_space<vmem>>, vector<1x128xf32>,
    %c0_45 = arith.constant 0 : index
    %c0_46 = arith.constant 0 : index
    %63 = vector.load %arg6[%c0_45, %c0_46] : memref<16x128xf32, #tpu.memory_space<vmem>>, vector<16x128xf32>
    %c0_47 = arith.constant 0 : index
    %c0_48 = arith.constant 0 : index
    %64 = vector.load %arg2[%c0_47, %c0_48] : memref<128x128xf32, #tpu.memory_space<vmem>>, vector<128x128xf32>
    %cst_49 = arith.constant dense<0.000000e+00> : vector<16x128xf32>
    %65 = tpu.matmul %63, %64, %cst_49 {dimension_numbers = #tpu.dot_dimension_numbers<[1], [0], [0], [1], [0, 0, 1, 1], [], []>} : vector<16x128xf32>, vector<128x128xf32>, vector<16x128xf32> -> vector<16x128xf32>
    %66 = tpu.iota {dimensions = array<i32: 0>} : vector<16x128xi32>
    %c0_i32 = arith.constant 0 : i32
    %67 = vector.broadcast %c0_i32 : i32 to vector<16x128xi32>
    %68 = arith.cmpi eq, %66, %67 : vector<16x128xi32>
    %69 = arith.select %68, %65, %63 : vector<16x128xi1>, vector<16x128xf32>
    %c0_50 = arith.constant 0 : index
    %c0_51 = arith.constant 0 : index
    %70 = vector.load %arg3[%c0_50, %c0_51] : memref<128x128xf32, #tpu.memory_space<vmem>>, vector<128x128xf32>
    %cst_52 = arith.constant dense<0.000000e+00> : vector<16x128xf32>
    %71 = tpu.matmul %69, %70, %cst_52 {dimension_numbers = #tpu.dot_dimension_numbers<[1], [0], [0], [1], [0, 0, 1, 1], [], []>} : vector<16x128xf32>, vector<128x128xf32>, vector<16x128xf32> -> vector<16x128xf32>
    %72 = vector.extract_strided_slice %71 {offsets = [0, 0], sizes = [16, 64], strides = [1, 1]} : vector<16x128xf32> to vector<16x64xf32>
    %73 = vector.extract_strided_slice %71 {offsets = [0, 64], sizes = [16, 64], strides = [1, 1]} : vector<16x128xf32> to vector<16x64xf32>
    %74 = arith.mulf %72, %72 : vector<16x64xf32>
    %75 = arith.mulf %73, %73 : vector<16x64xf32>
    %76 = arith.addf %74, %75 : vector<16x64xf32>
    %77 = vector.shape_cast %76 : vector<16x64xf32> to vector<1x16x64xf32>
    %cst_53 = arith.constant dense<0.000000e+00> : vector<1xf32>
    %78 = vector.multi_reduction <add>, %77, %cst_53 [1, 2] : vector<1x16x64xf32> to vector<1xf32>
    %79 = vector.shape_cast %78 : vector<1xf32> to vector<1x1x1xf32>
    %80 = vector.extract %79[0, 0, 0] : f32 from vector<1x1x1xf32>
    %81 = vector.broadcast %80 : f32 to vector<1x1xf32>
    %cst_54 = arith.constant 1.024000e+03 : f32
    %82 = vector.broadcast %cst_54 : f32 to vector<1x1xf32>
    %83 = arith.divf %81, %82 : vector<1x1xf32>
    %84 = vector.broadcast %83 : vector<1x1xf32> to vector<16x64xf32>
    %85 = arith.subf %76, %84 : vector<16x64xf32>
    %86 = arith.mulf %85, %85 : vector<16x64xf32>
    %87 = vector.shape_cast %86 : vector<16x64xf32> to vector<1x16x64xf32>
    %cst_55 = arith.constant dense<0.000000e+00> : vector<1xf32>
    %88 = vector.multi_reduction <add>, %87, %cst_55 [1, 2] : vector<1x16x64xf32> to vector<1xf32>
    %89 = vector.shape_cast %88 : vector<1xf32> to vector<1x1x1xf32>
    %90 = vector.extract %89[0, 0, 0] : f32 from vector<1x1x1xf32>
    %91 = vector.broadcast %90 : f32 to vector<1x1xf32>
    %cst_56 = arith.constant 1.023000e+03 : f32
    %92 = vector.broadcast %cst_56 : f32 to vector<1x1xf32>
    %93 = arith.divf %91, %92 : vector<1x1xf32>
    %94 = math.sqrt %93 : vector<1x1xf32>
    %95 = vector.broadcast %83 : vector<1x1xf32> to vector<16x64xf32>
    %96 = arith.subf %76, %95 : vector<16x64xf32>
    %97 = vector.broadcast %94 : vector<1x1xf32> to vector<16x64xf32>
    %98 = arith.divf %96, %97 : vector<16x64xf32>
    %99 = math.log %76 : vector<16x64xf32>
    %100 = vector.shape_cast %99 : vector<16x64xf32> to vector<1x16x64xf32>
    %cst_57 = arith.constant dense<0.000000e+00> : vector<1xf32>
    %101 = vector.multi_reduction <add>, %100, %cst_57 [1, 2] : vector<1x16x64xf32> to vector<1xf32>
    %102 = vector.shape_cast %101 : vector<1xf32> to vector<1x1x1xf32>
    %103 = vector.extract %102[0, 0, 0] : f32 from vector<1x1x1xf32>
    %104 = vector.broadcast %103 : f32 to vector<1x1xf32>
    %cst_58 = arith.constant 1.024000e+03 : f32
    %105 = vector.broadcast %cst_58 : f32 to vector<1x1xf32>
    %106 = arith.divf %104, %105 : vector<1x1xf32>
    %107 = vector.broadcast %106 : vector<1x1xf32> to vector<16x64xf32>
    %108 = arith.subf %99, %107 : vector<16x64xf32>
    %109 = arith.mulf %108, %108 : vector<16x64xf32>
    %110 = vector.shape_cast %109 : vector<16x64xf32> to vector<1x16x64xf32>
    %cst_59 = arith.constant dense<0.000000e+00> : vector<1xf32>
    %111 = vector.multi_reduction <add>, %110, %cst_59 [1, 2] : vector<1x16x64xf32> to vector<1xf32>
    %112 = vector.shape_cast %111 : vector<1xf32> to vector<1x1x1xf32>
    %113 = vector.extract %112[0, 0, 0] : f32 from vector<1x1x1xf32>
    %114 = vector.broadcast %113 : f32 to vector<1x1xf32>
    %cst_60 = arith.constant 1.023000e+03 : f32
    %115 = vector.broadcast %cst_60 : f32 to vector<1x1xf32>
    %116 = arith.divf %114, %115 : vector<1x1xf32>
    %117 = math.sqrt %116 : vector<1x1xf32>
    %118 = vector.broadcast %106 : vector<1x1xf32> to vector<16x64xf32>
    %119 = arith.subf %99, %118 : vector<16x64xf32>
    %120 = vector.broadcast %117 : vector<1x1xf32> to vector<16x64xf32>
    %121 = arith.divf %119, %120 : vector<16x64xf32>
    %122 = tpu.concatenate %98, %121 in 1 : vector<16x64xf32>, vector<16x64xf32> -> vector<16x128xf32>
    %c0_61 = arith.constant 0 : index
    %c0_62 = arith.constant 0 : index
    %123 = vector.load %arg4[%c0_61, %c0_62] : memref<16x128xf32, #tpu.memory_space<vmem>>, vector<16x128xf32>
    tpu.vector_store %arg4[%c0_61, %c0_62], %122 {strides = array<i32>} : memref<16x128xf32, #tpu.memory_space<vmem>>, vector<16x128xf32>,
    return
  }
}

</mosaic_0001>

<bundles_post_ra>
// kernel: tpu_custom_call.1
= control target key start
LH: loop header
LB: loop body
LE: loop exit
PB: predicated region body
PF: predicated region fallthrough
CT: control target
= control target key end

     0   :  { %9 = vsyncpa [#allocation5], 0  ;;  %s1213_s0 = inlined_call_operand.hbm [shape: f32[2,1088], index: 0, kind: input, shape index: {}]   ;;  %s1214_s1 = inlined_call_operand.hbm [shape: f32[1,1024], index: 1, kind: input, shape index: {}]   ;;  %s1215_s2 = inlined_call_operand.hbm [shape: f32[128,128], index: 2, kind: input, shape index: {}]   ;;  %s1216_s3 = inlined_call_operand.hbm [shape: f32[128,128], index: 3, kind: input, shape index: {}]   ;;  %s1217_s4 = inlined_call_operand.hbm [shape: f32[16,128], index: 4, kind: output, shape index: {}]  }
   0x1   :  { %10 = vsyncpa [#allocation8], 0 }
   0x2   :  { %11 = vsyncpa [#allocation11], 0  ;;  %s29_s17 = sshll.u32 %s1214_s1, 4  ;;  %s30_s17 = int_to_ptr.hbm [resolvable:$true] %s29_s17 }
   0x3   :  { %12 = vsyncpa [#allocation6], 0  ;;  %s982_s18 = smov [#allocation7]   ;;  %s18_s22 = sshll.u32 %s1213_s0, 4  ;;  %s19_s22 = int_to_ptr.hbm [resolvable:$true] %s18_s22 }
   0x4   :  { %s31_s19 = sshll.u32 %s982_s18, 4  ;;  %s983_s23 = smov [#allocation4]   ;;  %s32_s19 = int_to_ptr.vmem [resolvable:$true] %s31_s19 }
   0x5   :  { %34 = dma.hbm_to_vmem [thread:$0]  %s30_s17, 128, %s32_s19, [#allocation8]  }
   0x6   :  { %s20_s24 = sshll.u32 %s983_s23, 4  ;;  %s39_s27 = sshll.u32 %s1215_s2, 4  ;;  %s21_s24 = int_to_ptr.vmem [resolvable:$true] %s20_s24  ;;  %s40_s27 = int_to_ptr.hbm [resolvable:$true] %s39_s27 }
   0x7   :  { %23 = dma.hbm_to_vmem [thread:$0]  %s19_s22, 288, %s21_s24, [#allocation5]  }
   0x8   :  { %s984_s1 = smov [#allocation9]   ;;  %s52_s5 = sshll.u32 %s1216_s3, 4  ;;  %s53_s5 = int_to_ptr.hbm [resolvable:$true] %s52_s5 }
   0x9   :  { %s41_s28 = sshll.u32 %s984_s1, 4  ;;  %s985_s6 = smov 128   ;;  %s42_s28 = int_to_ptr.vmem [resolvable:$true] %s41_s28 }
   0xa   :  { %s986_s0 = smov 8   ;;  %s987_s7 = smov [#allocation10]  }
   0xb   :  { %47 = dma.hbm_to_vmem [thread:$0]  %s40_s27, 2048, %s42_s28, [#allocation8], %s985_s6, %s985_s6, %s986_s0  }
   0xc   :  { %s54_s8 = sshll.u32 %s987_s7, 4  ;;  %s55_s8 = int_to_ptr.vmem [resolvable:$true] %s54_s8 }
   0xd   :  { %60 = dma.hbm_to_vmem [thread:$0]  %s53_s5, 2048, %s55_s8, [#allocation11], %s985_s6, %s985_s6, %s986_s0  }
   0xe   :  { %974 = dma.done.wait [#allocation5], 288  }
   0xf   :  { %975 = vsyncadd [#allocation5], 4294967008 }
  0x10   :  { %976 = dma.done.wait [#allocation8], 2176  }
  0x11   :  { %977 = vsyncadd [#allocation8], 4294965120 }
  0x12   :  { %978 = dma.done.wait [#allocation11], 2048  }
  0x13   :  { %979 = vsyncadd [#allocation11], 4294965248  ;;  %v77_v0 = vld [vmem:[#allocation4] sm:$0xff]  ;;  %v78_v1 = vld [vmem:[#allocation4 + $0x8] sm:$0xff]  ;;  %s988_s2 = smov 96   ;;  %vm125_vm0 = vcmask 785408  }
  0x14   :  { %v772_v2 = vrot.slane %v77_v0, 9  ;;  %v773_v3 = vrot.slane %v78_v1, 9  ;;  %v79_v9 = vld [vmem:[#allocation4 + $0x10] sm:$0x3]  ;;  %vm142_vm1 = vcmask 1040384   ;;  %v989_v57 = vmov 1024.0  }
  0x15   :  { %v774_v13 = vrot.slane %v79_v9, 9  ;;  %836 = vrcp.f32 %v989_v57  ;;  %s993_s10 = smov 32   ;;  %vm291_vm6 = vcmask 261120   ;;  %vm293_vm7 = vcmask 1041408   ;;  %s995_s11 = smov 127  }
  0x16   :  { %v1042_v4 = vsub.f32 %v77_v0, %v772_v2  ;;  %v1044_v5 = vsub.f32 %v78_v1, %v773_v3  ;;  %vm316_vm8 = vcmask 1042434   ;;  %vm319_vm9 = vcmask 1044484   ;;  %s996_s12 = smov 63   ;;  %s997_s13 = smov 64  }
  0x17   :  { %v1058_v14 = vsub.f32 %v79_v9, %v774_v13  ;;  %vm321_vm10 = vcmask 1046534   ;;  %vm323_vm11 = vcmask 1045508   ;;  %vm325_vm12 = vcmask 1043456   ;;  %s998_s18 = smov [#allocation12]   ;;  %s757_s22 = sshll.u32 %s1217_s4, 4  ;;  %s758_s22 = int_to_ptr.hbm [resolvable:$true] %s757_s22 }
  0x18   :  { %v100_v6 = vperm.slane %v1042_v4, 4  ;;  %v98_v7 = vperm.slane %v1042_v4, 0  ;;  %v102_v8 = vperm.slane %v1044_v5, 0  ;;  %v101_v10 = vperm.slane %v1042_v4, 6  ;;  %s755_s19 = sshll.u32 %s998_s18, 4  ;;  %s756_s19 = int_to_ptr.vmem [resolvable:$true] %s755_s19 }
  0x19   :  { %v99_v11 = vperm.slane %v1042_v4, 2  ;;  %v103_v12 = vperm.slane %v1044_v5, 2  ;;  %v105_v15 = vperm.slane %v1044_v5, 6  ;;  %v104_v16 = vperm.slane %v1044_v5, 4 }
  0x1a   :  { %111 = vrot.lane.b32.xlu1 %v100_v6, %s988_s2  ;;  %107 = vrot.lane.b32.xlu0 %v98_v7, %s988_s2  ;;  %v106_v17 = vperm.slane %v1058_v14, 0  ;;  %vm336_vm14 = vcmask 1046528   ;;  %vm356_vm15 = vcmask 1039360  }
  0x1b   :  { %115 = vrot.lane.b32.xlu2 %v102_v8, %s988_s2  ;;  %v837_v58 = vpop.eup %836 }
  0x1c   :  { %v169_v59 = vmul.f32 1024.0, %v837_v58  ;;  %vm173_vm2 = vweird.f32 %v837_v58 }
  0x1e   :  { %v170_v60 = vsub.f32 1.0, %v169_v59  ;;  %v990_v59 = vmov 1023.0  }
  0x1f   :  { %838 = vrcp.f32 %v990_v59 }
  0x20   :  { %v171_v61 = vmul.f32 %v837_v58, %v170_v60 }
  0x22   :  { %113 = vrot.lane.b32.xlu1 %v101_v10, %s988_s2  ;;  %109 = vrot.lane.b32.xlu0 %v99_v11, %s988_s2  ;;  %v172_v62 = vadd.f32 %v837_v58, %v171_v61 }
  0x23   :  { %117 = vrot.lane.b32.xlu2 %v103_v12, %s988_s2 }
  0x24   :  { %v1082_v63 = vsel %vm173_vm2, %v837_v58, %v172_v62  ;;  %vm614_vm2 = vcmask 523264  }
  0x25   :  { %v839_v60 = vpop.eup %838 }
  0x26   :  { %v254_v61 = vmul.f32 1023.0, %v839_v60  ;;  %vm258_vm3 = vweird.f32 %v839_v60 }
  0x28   :  { %v255_v62 = vsub.f32 1.0, %v254_v61 }
  0x2a   :  { %121 = vrot.lane.b32.xlu1 %v105_v15, %s988_s2  ;;  %119 = vrot.lane.b32.xlu0 %v104_v16, %s988_s2 }
  0x2b   :  { %123 = vrot.lane.b32.xlu2 %v106_v17, %s988_s2 }
  0x75   :  { %v116_v18 = vpop.permute.xlu2 %115 }
  0x7d   :  { %v118_v21 = vpop.permute.xlu2 %117 }
  0x7e   :  { %v130_v32 = vsel %vm125_vm0, %v116_v18, %v118_v21 }
  0x7f   :  { %v150_v37 = vsel %vm142_vm1, %v130_v32, 0.0 }
  0x85   :  { %v124_v36 = vpop.permute.xlu2 %123 }
  0x8c   :  { %v112_v19 = vpop.permute.xlu1 %111  ;;  %v108_v20 = vpop.permute.xlu0 %107 }
  0x94   :  { %v114_v22 = vpop.permute.xlu1 %113  ;;  %v110_v23 = vpop.permute.xlu0 %109 }
  0x95   :  { %v128_v24 = vsel %vm125_vm0, %v112_v19, %v114_v22  ;;  %v126_v25 = vsel %vm125_vm0, %v108_v20, %v110_v23  ;;  %v127_v26 = vsel %vm125_vm0, %v110_v23, %v112_v19  ;;  %v129_v29 = vsel %vm125_vm0, %v114_v22, %v116_v18 }
  0x96   :  { %v143_v27 = vsel %vm142_vm1, %v126_v25, 0.0  ;;  %v144_v28 = vsel %vm142_vm1, %v127_v26, 0.0  ;;  %v146_v31 = vsel %vm142_vm1, %v128_v24, 0.0  ;;  %v148_v34 = vsel %vm142_vm1, %v129_v29, 0.0 }
  0x97   :  { %v145_v30 = vadd.f32 %v144_v28, %v143_v27 }
  0x99   :  { %v147_v33 = vadd.f32 %v146_v31, %v145_v30 }
  0x9b   :  { %v149_v35 = vadd.f32 %v148_v34, %v147_v33 }
  0x9c   :  { %v122_v38 = vpop.permute.xlu1 %121  ;;  %v120_v39 = vpop.permute.xlu0 %119 }
  0x9d   :  { %v151_v40 = vadd.f32 %v150_v37, %v149_v35  ;;  %v131_v41 = vsel %vm125_vm0, %v118_v21, %v120_v39  ;;  %v132_v42 = vsel %vm125_vm0, %v120_v39, %v122_v38  ;;  %v133_v45 = vsel %vm125_vm0, %v122_v38, %v124_v36 }
  0x9e   :  { %v152_v43 = vsel %vm142_vm1, %v131_v41, 0.0  ;;  %v154_v46 = vsel %vm142_vm1, %v132_v42, 0.0  ;;  %v156_v48 = vsel %vm142_vm1, %v133_v45, 0.0 }
  0x9f   :  { %v153_v44 = vadd.f32 %v152_v43, %v151_v40 }
  0xa1   :  { %v155_v47 = vadd.f32 %v154_v46, %v153_v44 }
  0xa3   :  { %v157_v49 = vadd.f32 %v156_v48, %v155_v47 }
  0xa5   :  { %158 = vadd.xlane.f32.xlu0 %v157_v49 }
 0x118   :  { %v159_v50 = vpop.xlane.xlu0 %158 }
 0x119   :  { %v160_v51 = vrot.slane %v159_v50, 4 }
 0x11b   :  { %v161_v52 = vadd.f32 %v160_v51, %v159_v50 }
 0x11d   :  { %v162_v53 = vrot.slane %v161_v52, 2 }
 0x11f   :  { %v163_v54 = vadd.f32 %v162_v53, %v161_v52 }
 0x121   :  { %v164_v55 = vrot.slane %v163_v54, 1 }
 0x123   :  { %v165_v56 = vadd.f32 %v164_v55, %v163_v54 }
 0x125   :  { %807 = vpush %v165_v56 }
 0x156   :  { %s808_s3 = spop %807 }
 0x157   :  { %v167_v0 = vstv %s808_s3 }
 0x158   :  { %v175_v1 = vmul.f32 %v1082_v63, %v167_v0  ;;  %v256_v0 = vmul.f32 %v839_v60, %v255_v62 }
 0x15a   :  { %v176_v2 = vsub.f32 %v1042_v4, %v175_v1  ;;  %v177_v8 = vsub.f32 %v1044_v5, %v175_v1  ;;  %v178_v17 = vsub.f32 %v1058_v14, %v175_v1  ;;  %v257_v1 = vadd.f32 %v839_v60, %v256_v0 }
 0x15c   :  { %v179_v3 = vmul.f32 %v176_v2, %v176_v2  ;;  %v180_v11 = vmul.f32 %v177_v8, %v177_v8  ;;  %v181_v18 = vmul.f32 %v178_v17, %v178_v17  ;;  %v1113_v2 = vsel %vm258_vm3, %v839_v60, %v257_v1 }
 0x15d   :  { %v992_v17 = vmov 857870592  }
 0x15e   :  { %v186_v6 = vperm.slane %v179_v3, 2  ;;  %v185_v7 = vperm.slane %v179_v3, 0  ;;  %v188_v9 = vperm.slane %v179_v3, 6  ;;  %v187_v10 = vperm.slane %v179_v3, 4 }
 0x15f   :  { %v190_v12 = vperm.slane %v180_v11, 2  ;;  %v189_v13 = vperm.slane %v180_v11, 0  ;;  %v192_v15 = vperm.slane %v180_v11, 6  ;;  %v191_v16 = vperm.slane %v180_v11, 4 }
 0x160   :  { %196 = vrot.lane.b32.xlu2 %v186_v6, %s988_s2  ;;  %194 = vrot.lane.b32.xlu1 %v185_v7, %s988_s2  ;;  %v193_v19 = vperm.slane %v181_v18, 0  ;;  %v278_v18 = vunpack.c.l.s4 %v992_v17 }
 0x168   :  { %200 = vrot.lane.b32.xlu2 %v188_v9, %s988_s2  ;;  %198 = vrot.lane.b32.xlu1 %v187_v10, %s988_s2 }
 0x170   :  { %204 = vrot.lane.b32.xlu2 %v190_v12, %s988_s2  ;;  %202 = vrot.lane.b32.xlu1 %v189_v13, %s988_s2 }
 0x178   :  { %208 = vrot.lane.b32.xlu2 %v192_v15, %s988_s2  ;;  %206 = vrot.lane.b32.xlu1 %v191_v16, %s988_s2  ;;  %v991_v15 = vmov 2003195204  }
 0x179   :  { %v282_v16 = vunpack.c.l.s4 %v991_v15 }
 0x180   :  { %210 = vrot.lane.b32.xlu1 %v193_v19, %s988_s2 }
 0x1ba   :  { %v197_v20 = vpop.permute.xlu2 %196 }
 0x1c2   :  { %v201_v22 = vpop.permute.xlu2 %200 }
 0x1ca   :  { %v205_v32 = vpop.permute.xlu2 %204 }
 0x1d2   :  { %v195_v21 = vpop.permute.xlu1 %194  ;;  %v209_v43 = vpop.permute.xlu2 %208 }
 0x1d3   :  { %v212_v25 = vsel %vm125_vm0, %v195_v21, %v197_v20  ;;  %v261_v21 = vld [vmem:[#allocation7] sm:$0xff] }
 0x1d4   :  { %v228_v27 = vsel %vm142_vm1, %v212_v25, 0.0  ;;  %v279_v25 = vunpack.c.0.s8 %v278_v18 }
 0x1da   :  { %v199_v23 = vpop.permute.xlu1 %198 }
 0x1db   :  { %v213_v24 = vsel %vm125_vm0, %v197_v20, %v199_v23  ;;  %v214_v29 = vsel %vm125_vm0, %v199_v23, %v201_v22 }
 0x1dc   :  { %v229_v26 = vsel %vm142_vm1, %v213_v24, 0.0  ;;  %v231_v33 = vsel %vm142_vm1, %v214_v29, 0.0  ;;  %v283_v24 = vunpack.c.0.s8 %v282_v16 }
 0x1dd   :  { %v230_v30 = vadd.f32 %v229_v26, %v228_v27 }
 0x1df   :  { %v232_v35 = vadd.f32 %v231_v33, %v230_v30 }
 0x1e2   :  { %v203_v28 = vpop.permute.xlu1 %202 }
 0x1e3   :  { %v215_v31 = vsel %vm125_vm0, %v201_v22, %v203_v28  ;;  %v216_v36 = vsel %vm125_vm0, %v203_v28, %v205_v32 }
 0x1e4   :  { %v233_v34 = vsel %vm142_vm1, %v215_v31, 0.0  ;;  %v235_v40 = vsel %vm142_vm1, %v216_v36, 0.0 }
 0x1e5   :  { %v234_v37 = vadd.f32 %v233_v34, %v232_v35 }
 0x1e7   :  { %v236_v42 = vadd.f32 %v235_v40, %v234_v37 }
 0x1ea   :  { %v207_v38 = vpop.permute.xlu1 %206 }
 0x1eb   :  { %v217_v39 = vsel %vm125_vm0, %v205_v32, %v207_v38  ;;  %v218_v44 = vsel %vm125_vm0, %v207_v38, %v209_v43 }
 0x1ec   :  { %v237_v41 = vsel %vm142_vm1, %v217_v39, 0.0  ;;  %v239_v46 = vsel %vm142_vm1, %v218_v44, 0.0 }
 0x1ed   :  { %v238_v45 = vadd.f32 %v237_v41, %v236_v42 }
 0x1ef   :  { %v240_v49 = vadd.f32 %v239_v46, %v238_v45 }
 0x1f2   :  { %v211_v47 = vpop.permute.xlu1 %210 }
 0x1f3   :  { %v219_v48 = vsel %vm125_vm0, %v209_v43, %v211_v47 }
 0x1f4   :  { %v241_v50 = vsel %vm142_vm1, %v219_v48, 0.0 }
 0x1f5   :  { %v242_v51 = vadd.f32 %v241_v50, %v240_v49 }
 0x1f7   :  { %243 = vadd.xlane.f32.xlu2 %v242_v51 }
 0x26a   :  { %v244_v52 = vpop.xlane.xlu2 %243 }
 0x26b   :  { %v245_v53 = vrot.slane %v244_v52, 4 }
 0x26d   :  { %v246_v54 = vadd.f32 %v245_v53, %v244_v52 }
 0x26f   :  { %v247_v55 = vrot.slane %v246_v54, 2 }
 0x271   :  { %v248_v56 = vadd.f32 %v247_v55, %v246_v54 }
 0x273   :  { %v249_v57 = vrot.slane %v248_v56, 1 }
 0x275   :  { %v250_v58 = vadd.f32 %v249_v57, %v248_v56  ;;  %v341_v56 = vlaneseq  ;;  %v994_v57 = vmov 0.0  }
 0x277   :  { %809 = vpush %v250_v58  ;;  %vm343_vm13 = vcmp.lt.s32.totalorder %v341_v56, 128 }
 0x278   :  { %345 = vst.msk [vmem:[#allocation2 + $0x8] sm:$0x1] %vm343_vm13, %v994_v57 }
 0x2a8   :  { %s810_s9 = spop %809 }
 0x2a9   :  { %v252_v3 = vstv %s810_s9 }
 0x2aa   :  { %v260_v6 = vmul.f32 %v1113_v2, %v252_v3 }
 0x2ac   :  { %840 = vrsqrt.f32 %v260_v6  ;;  %vm269_vm4 = vcmp.eq.f32.partialorder %v260_v6, inf  ;;  %v272_v19 = vand.u32 2147483648, %v260_v6  ;;  %vm271_vm5 = vcmp.eq.f32.partialorder %v260_v6, 0.0 }
 0x2b2   :  { %v841_v7 = vpop.eup %840 }
 0x2b3   :  { %v263_v8 = vmul.f32 %v841_v7, %v260_v6 }
 0x2b5   :  { %v264_v9 = vmul.f32 %v841_v7, %v263_v8 }
 0x2b7   :  { %v265_v10 = vmul.f32 0.5, %v264_v9 }
 0x2b9   :  { %v266_v11 = vsub.f32 1.5, %v265_v10 }
 0x2bb   :  { %v267_v12 = vmul.f32 %v841_v7, %v266_v11 }
 0x2bd   :  { %v268_v13 = vmul.f32 %v267_v12, %v260_v6 }
 0x2bf   :  { %v270_v20 = vsel %vm269_vm4, %v260_v6, %v268_v13 }
 0x2c0   :  { %v273_v22 = vsel %vm271_vm5, %v272_v19, %v270_v20 }
 0x2c1   :  { %v274_v23 = vmul.f32 0.1, %v273_v22 }
 0x2c3   :  { %v275_v26 = vmul.f32 %v274_v23, %v261_v21 }
 0x2c5   :  { %v284_v27 = vperm.slane %v275_v26, %v283_v24  ;;  %v280_v28 = vperm.slane %v275_v26, %v279_v25 }
 0x2c7   :  { %287 = vrot.lane.b32.xlu0 %v284_v27, %s993_s10  ;;  %285 = vrot.lane.b32.xlu1 %v280_v28, %s993_s10 }
 0x339   :  { %v288_v29 = vpop.permute.xlu0 %287  ;;  %v286_v30 = vpop.permute.xlu1 %285 }
 0x33a   :  { %v290_v31 = vrot.slane %v288_v29, 6  ;;  %v289_v32 = vrot.slane %v286_v30, 6 }
 0x33c   :  { %v292_v33 = vsel %vm291_vm6, %v289_v32, %v286_v30  ;;  %v294_v34 = vsel %vm293_vm7, %v289_v32, %v290_v31  ;;  %v301_v45 = vadd.f32 %v290_v31, %v1058_v14 }
 0x33d   :  { %v295_v35 = vsel %vm291_vm6, %v294_v34, %v288_v29  ;;  %v299_v36 = vadd.f32 %v292_v33, %v1042_v4 }
 0x33e   :  { %v300_v37 = vadd.f32 %v295_v35, %v1044_v5  ;;  %v312_v51 = vrot.slane %v301_v45, 1  ;;  %v313_v52 = vrot.slane %v301_v45, 2  ;;  %v314_v53 = vrot.slane %v301_v45, 3 }
 0x33f   :  { %v305_v38 = vrot.slane %v299_v36, 1  ;;  %v306_v39 = vrot.slane %v299_v36, 2  ;;  %v307_v40 = vrot.slane %v299_v36, 3 }
 0x340   :  { %v308_v41 = vrot.slane %v300_v37, 4  ;;  %v309_v42 = vrot.slane %v300_v37, 5  ;;  %v310_v43 = vrot.slane %v300_v37, 6  ;;  %v311_v44 = vrot.slane %v300_v37, 7 }
 0x341   :  { %v315_v46 = vsel %vm142_vm1, %v299_v36, %v305_v38  ;;  %v317_v47 = vsel %vm316_vm8, %v306_v39, %v307_v40  ;;  %v327_v54 = vsel %vm142_vm1, %v301_v45, %v312_v51  ;;  %v328_v14 = vsel %vm316_vm8, %v313_v52, %v314_v53  ;;  %v530_v51 = vld [vmem:[#allocation9 + $0x68] sm:$0xff]  ;;  %v529_v52 = vld [vmem:[#allocation9 + $0x60] sm:$0xff]  ;;  %v528_v53 = vld [vmem:[#allocation9 + $0x58] sm:$0xff] }
 0x342   :  { %v318_v4 = vsel %vm293_vm7, %v315_v46, %v317_v47  ;;  %v320_v5 = vsel %vm319_vm9, %v308_v41, %v309_v42  ;;  %v322_v48 = vsel %vm321_vm10, %v310_v43, %v311_v44  ;;  %v329_v55 = vsel %vm293_vm7, %v327_v54, %v328_v14  ;;  %v527_v54 = vld [vmem:[#allocation9 + $0x50] sm:$0xff]  ;;  %v526_v14 = vld [vmem:[#allocation9 + $0x48] sm:$0xff] }
 0x343   :  { %v324_v49 = vsel %vm323_vm11, %v320_v5, %v322_v48 }
 0x344   :  { %v326_v50 = vsel %vm325_vm12, %v318_v4, %v324_v49  ;;  %v532_v49 = vld [vmem:[#allocation9 + $0x78] sm:$0xff] }
 0x345   :  { %330 = vrot.lane.b32.xlu1 %v326_v50, %s988_s2  ;;  %v531_v50 = vld [vmem:[#allocation9 + $0x70] sm:$0xff]  ;;  %533 = vmatpush.msra.mxu0 %v532_v49 }
 0x346   :  { %775 = vmatpush.msra.mxu2 %v532_v49 }
 0x347   :  { %534 = vmatpush.msra.mxu0 %v531_v50 }
 0x348   :  { %776 = vmatpush.msra.mxu2 %v531_v50  ;;  %v563_v50 = vld [vmem:[#allocation10] sm:$0xff] }
 0x349   :  { %535 = vmatpush.msra.mxu0 %v530_v51 }
 0x34a   :  { %777 = vmatpush.msra.mxu2 %v530_v51 }
 0x34b   :  { %536 = vmatpush.msra.mxu0 %v529_v52 }
 0x34c   :  { %778 = vmatpush.msra.mxu2 %v529_v52 }
 0x34d   :  { %332 = vrot.lane.b32.xlu1 %v329_v55, %s988_s2  ;;  %537 = vmatpush.msra.mxu0 %v528_v53 }
 0x34e   :  { %779 = vmatpush.msra.mxu2 %v528_v53 }
 0x34f   :  { %538 = vmatpush.msra.mxu0 %v527_v54 }
 0x350   :  { %780 = vmatpush.msra.mxu2 %v527_v54 }
 0x351   :  { %539 = vmatpush.msra.mxu0 %v526_v14 }
 0x352   :  { %781 = vmatpush.msra.mxu2 %v526_v14 }
 0x3b7   :  { %v331_v58 = vpop.permute.xlu1 %330 }
 0x3b8   :  { %v334_v60 = vrot.slane %v331_v58, 1 }
 0x3bf   :  { %v333_v59 = vpop.permute.xlu1 %332 }
 0x3c0   :  { %v335_v61 = vrot.slane %v333_v59, 1  ;;  %v525_v59 = vld [vmem:[#allocation9 + $0x40] sm:$0xff] }
 0x3c1   :  { %540 = vmatpush.msra.mxu0 %v525_v59  ;;  %782 = vmatpush.msra.mxu2 %v525_v59 }
 0x3c2   :  { %v337_v62 = vsel %vm336_vm14, %v334_v60, %v335_v61  ;;  %v524_v60 = vld [vmem:[#allocation9 + $0x38] sm:$0xff]  ;;  %v523_v61 = vld [vmem:[#allocation9 + $0x30] sm:$0xff] }
 0x3c3   :  { %v338_v0 = vsel %vm125_vm0, %v331_v58, %v337_v62  ;;  %541 = vmatpush.msra.mxu0 %v524_v60  ;;  %783 = vmatpush.msra.mxu2 %v524_v60  ;;  %vm368_vm0 = vcmask 515072   ;;  %v522_v62 = vld [vmem:[#allocation9 + $0x28] sm:$0xff] }
 0x3c4   :  { %340 = vst [vmem:[#allocation2] sm:$0xff] %v338_v0 }
 0x3c5   :  { %542 = vmatpush.msra.mxu0 %v523_v61  ;;  %784 = vmatpush.msra.mxu2 %v523_v61 }
 0x3c7   :  { %543 = vmatpush.msra.mxu0 %v522_v62  ;;  %785 = vmatpush.msra.mxu2 %v522_v62 }
 0x3cb   :  { %v372_v1 = vld [vmem:[#allocation2 + $0x1] sm:$0x3]  ;;  %v346_v13 = vld [vmem:[#allocation2] sm:$0x1]  ;;  %v427_v16 = vld [vmem:[#allocation2 + $0x3] sm:$0x3] }
 0x3cc   :  { %v348_v3 = vld [vmem:[#allocation2] sm:$0x3]  ;;  %v374_v6 = vperm.slane %v372_v1, 0  ;;  %v405_v9 = vld [vmem:[#allocation2 + $0x2] sm:$0x3]  ;;  %v429_v18 = vperm.slane %v427_v16, 0 }
 0x3cd   :  { %v351_v7 = vperm.slane %v348_v3, 1  ;;  %v350_v8 = vperm.slane %v348_v3, 0  ;;  %v360_v10 = vld [vmem:[#allocation2] sm:$0x3]  ;;  %v408_v11 = vperm.slane %v405_v9, 1  ;;  %v375_v20 = vperm.slane %v372_v1, 1 }
 0x3ce   :  { %376 = vrot.lane.b32.xlu2 %v374_v6, %s995_s11  ;;  %v363_v12 = vperm.slane %v360_v10, 1  ;;  %v362_v15 = vperm.slane %v360_v10, 0  ;;  %347 = vst [vmem:[#allocation3] sm:$0x1] %v346_v13  ;;  %v383_v17 = vld [vmem:[#allocation2 + $0x1] sm:$0x3] }
 0x3cf   :  { %354 = vrot.lane.b32.xlu1 %v351_v7, %s995_s11  ;;  %352 = vrot.lane.b32.xlu0 %v350_v8, %s995_s11  ;;  %v385_v19 = vperm.slane %v383_v17, 0  ;;  %v438_v21 = vld [vmem:[#allocation2 + $0x4] sm:$0x3]  ;;  %v394_v22 = vld [vmem:[#allocation2 + $0x2] sm:$0x3]  ;;  %v386_v25 = vperm.slane %v383_v17, 1 }
 0x3d0   :  { %v441_v23 = vperm.slane %v438_v21, 1  ;;  %v396_v24 = vperm.slane %v394_v22, 0  ;;  %v460_v26 = vld [vmem:[#allocation2 + $0x5] sm:$0x3]  ;;  %v407_v28 = vperm.slane %v405_v9, 0  ;;  %v397_v29 = vperm.slane %v394_v22, 1 }
 0x3d1   :  { %v462_v27 = vperm.slane %v460_v26, 0  ;;  %v471_v30 = vld [vmem:[#allocation2 + $0x5] sm:$0x3]  ;;  %v416_v31 = vld [vmem:[#allocation2 + $0x3] sm:$0x3]  ;;  %v440_v37 = vperm.slane %v438_v21, 0 }
 0x3d2   :  { %v474_v32 = vperm.slane %v471_v30, 1  ;;  %v419_v33 = vperm.slane %v416_v31, 1  ;;  %v418_v34 = vperm.slane %v416_v31, 0  ;;  %v493_v35 = vld [vmem:[#allocation2 + $0x6] sm:$0x3]  ;;  %v430_v38 = vperm.slane %v427_v16, 1 }
 0x3d3   :  { %v495_v36 = vperm.slane %v493_v35, 0  ;;  %v504_v39 = vld [vmem:[#allocation2 + $0x7] sm:$0x3]  ;;  %v449_v40 = vld [vmem:[#allocation2 + $0x4] sm:$0x3]  ;;  %v473_v44 = vperm.slane %v471_v30, 0 }
 0x3d4   :  { %v507_v41 = vperm.slane %v504_v39, 1  ;;  %v452_v42 = vperm.slane %v449_v40, 1  ;;  %v451_v43 = vperm.slane %v449_v40, 0  ;;  %v463_v45 = vperm.slane %v460_v26, 1  ;;  %v482_v46 = vld [vmem:[#allocation2 + $0x6] sm:$0x3] }
 0x3d5   :  { %v485_v47 = vperm.slane %v482_v46, 1  ;;  %v484_v4 = vperm.slane %v482_v46, 0  ;;  %v506_v5 = vperm.slane %v504_v39, 0  ;;  %v496_v48 = vperm.slane %v493_v35, 1  ;;  %v521_v7 = vld [vmem:[#allocation9 + $0x20] sm:$0xff]  ;;  %v520_v8 = vld [vmem:[#allocation9 + $0x18] sm:$0xff] }
 0x3d6   :  { %411 = vrot.lane.b32.xlu2 %v408_v11, %s996_s12  ;;  %544 = vmatpush.msra.mxu0 %v521_v7  ;;  %v519_v9 = vld [vmem:[#allocation9 + $0x10] sm:$0xff]  ;;  %v518_v10 = vld [vmem:[#allocation9 + $0x8] sm:$0xff]  ;;  %v567_v46 = vld [vmem:[#allocation10 + $0x20] sm:$0xff] }
 0x3d7   :  { %366 = vrot.lane.b32.xlu1 %v363_v12, %s996_s12  ;;  %364 = vrot.lane.b32.xlu0 %v362_v15, %s996_s12  ;;  %v517_v15 = vld [vmem:[#allocation9] sm:$0xff]  ;;  %v577_v21 = vld [vmem:[#allocation10 + $0x70] sm:$0xff]  ;;  %v576_v22 = vld [vmem:[#allocation10 + $0x68] sm:$0xff] }
 0x3d8   :  { %786 = vmatpush.msra.mxu2 %v521_v7  ;;  %545 = vmatpush.msra.mxu0 %v520_v8  ;;  %v573_v30 = vld [vmem:[#allocation10 + $0x50] sm:$0xff]  ;;  %v572_v31 = vld [vmem:[#allocation10 + $0x48] sm:$0xff]  ;;  %v557_v7 = vshrl.u32 %v341_v56, 7 }
 0x3d9   :  { %v568_v39 = vld [vmem:[#allocation10 + $0x28] sm:$0xff] }
 0x3da   :  { %787 = vmatpush.msra.mxu2 %v520_v8  ;;  %546 = vmatpush.msra.mxu0 %v519_v9  ;;  %vm559_vm1 = vcmp.eq.s32.totalorder %v557_v7, 0 }
 0x3dc   :  { %788 = vmatpush.msra.mxu2 %v519_v9  ;;  %547 = vmatpush.msra.mxu0 %v518_v10 }
 0x3de   :  { %431 = vrot.lane.b32.xlu2 %v429_v18, %s996_s12  ;;  %789 = vmatpush.msra.mxu2 %v518_v10 }
 0x3df   :  { %387 = vrot.lane.b32.xlu1 %v385_v19, %s996_s12  ;;  %378 = vrot.lane.b32.xlu0 %v375_v20, %s995_s11  ;;  %v578_v20 = vld [vmem:[#allocation10 + $0x78] sm:$0xff] }
 0x3e0   :  { %548 = vmatpush.msra.mxu0 %v517_v15  ;;  %790 = vmatpush.msra.mxu2 %v517_v15 }
 0x3e1   :  { %791 = vmatpush.msra.mxu3 %v578_v20  ;;  %579 = vmatpush.msra.mxu1 %v578_v20 }
 0x3e3   :  { %792 = vmatpush.msra.mxu3 %v577_v21  ;;  %580 = vmatpush.msra.mxu1 %v577_v21 }
 0x3e5   :  { %793 = vmatpush.msra.mxu3 %v576_v22  ;;  %581 = vmatpush.msra.mxu1 %v576_v22 }
 0x3e6   :  { %444 = vrot.lane.b32.xlu2 %v441_v23, %s995_s11 }
 0x3e7   :  { %398 = vrot.lane.b32.xlu1 %v396_v24, %s995_s11  ;;  %389 = vrot.lane.b32.xlu0 %v386_v25, %s996_s12 }
 0x3ee   :  { %464 = vrot.lane.b32.xlu2 %v462_v27, %s995_s11 }
 0x3ef   :  { %409 = vrot.lane.b32.xlu1 %v407_v28, %s996_s12  ;;  %400 = vrot.lane.b32.xlu0 %v397_v29, %s995_s11  ;;  %v575_v28 = vld [vmem:[#allocation10 + $0x60] sm:$0xff]  ;;  %v574_v29 = vld [vmem:[#allocation10 + $0x58] sm:$0xff] }
 0x3f0   :  { %794 = vmatpush.msra.mxu3 %v575_v28  ;;  %582 = vmatpush.msra.mxu1 %v575_v28 }
 0x3f2   :  { %795 = vmatpush.msra.mxu3 %v574_v29  ;;  %583 = vmatpush.msra.mxu1 %v574_v29 }
 0x3f4   :  { %796 = vmatpush.msra.mxu3 %v573_v30  ;;  %584 = vmatpush.msra.mxu1 %v573_v30 }
 0x3f6   :  { %477 = vrot.lane.b32.xlu2 %v474_v32, %s996_s12  ;;  %797 = vmatpush.msra.mxu3 %v572_v31 }
 0x3f7   :  { %422 = vrot.lane.b32.xlu1 %v419_v33, %s995_s11  ;;  %420 = vrot.lane.b32.xlu0 %v418_v34, %s995_s11 }
 0x3f8   :  { %585 = vmatpush.msra.mxu1 %v572_v31 }
 0x3fe   :  { %497 = vrot.lane.b32.xlu2 %v495_v36, %s996_s12  ;;  %v571_v36 = vld [vmem:[#allocation10 + $0x40] sm:$0xff] }
 0x3ff   :  { %442 = vrot.lane.b32.xlu1 %v440_v37, %s995_s11  ;;  %433 = vrot.lane.b32.xlu0 %v430_v38, %s996_s12  ;;  %v570_v37 = vld [vmem:[#allocation10 + $0x38] sm:$0xff]  ;;  %v569_v38 = vld [vmem:[#allocation10 + $0x30] sm:$0xff] }
 0x400   :  { %798 = vmatpush.msra.mxu3 %v571_v36  ;;  %586 = vmatpush.msra.mxu1 %v571_v36 }
 0x402   :  { %799 = vmatpush.msra.mxu3 %v570_v37  ;;  %587 = vmatpush.msra.mxu1 %v570_v37 }
 0x404   :  { %800 = vmatpush.msra.mxu3 %v569_v38  ;;  %588 = vmatpush.msra.mxu1 %v569_v38 }
 0x406   :  { %510 = vrot.lane.b32.xlu2 %v507_v41, %s995_s11  ;;  %801 = vmatpush.msra.mxu3 %v568_v39 }
 0x407   :  { %455 = vrot.lane.b32.xlu1 %v452_v42, %s996_s12  ;;  %453 = vrot.lane.b32.xlu0 %v451_v43, %s996_s12 }
 0x408   :  { %589 = vmatpush.msra.mxu1 %v568_v39  ;;  %802 = vmatpush.msra.mxu3 %v567_v46 }
 0x40a   :  { %590 = vmatpush.msra.mxu1 %v567_v46 }
 0x40f   :  { %475 = vrot.lane.b32.xlu1 %v473_v44, %s996_s12  ;;  %466 = vrot.lane.b32.xlu0 %v463_v45, %s995_s11 }
 0x417   :  { %488 = vrot.lane.b32.xlu1 %v485_v47, %s995_s11  ;;  %486 = vrot.lane.b32.xlu0 %v484_v4, %s995_s11  ;;  %v566_v47 = vld [vmem:[#allocation10 + $0x18] sm:$0xff]  ;;  %v565_v4 = vld [vmem:[#allocation10 + $0x10] sm:$0xff] }
 0x418   :  { %803 = vmatpush.msra.mxu3 %v566_v47  ;;  %591 = vmatpush.msra.mxu1 %v566_v47 }
 0x41a   :  { %804 = vmatpush.msra.mxu3 %v565_v4  ;;  %592 = vmatpush.msra.mxu1 %v565_v4 }
 0x41f   :  { %508 = vrot.lane.b32.xlu1 %v506_v5, %s995_s11  ;;  %499 = vrot.lane.b32.xlu0 %v496_v48, %s996_s12  ;;  %v564_v5 = vld [vmem:[#allocation10 + $0x8] sm:$0xff] }
 0x420   :  { %805 = vmatpush.msra.mxu3 %v564_v5  ;;  %593 = vmatpush.msra.mxu1 %v564_v5 }
 0x422   :  { %806 = vmatpush.msra.mxu3 %v563_v50  ;;  %594 = vmatpush.msra.mxu1 %v563_v50 }
 0x428   :  { %v377_v3 = vpop.permute.xlu2 %376 }
 0x430   :  { %v412_v16 = vpop.permute.xlu2 %411 }
 0x438   :  { %v432_v23 = vpop.permute.xlu2 %431 }
 0x440   :  { %v445_v32 = vpop.permute.xlu2 %444 }
 0x441   :  { %v355_v55 = vpop.permute.xlu1 %354  ;;  %v353_v57 = vpop.permute.xlu0 %352 }
 0x442   :  { %v357_v58 = vsel %vm356_vm15, %v353_v57, %v355_v55 }
 0x443   :  { %359 = vst [vmem:[#allocation3 + $0x1] sm:$0x1] %v357_v58 }
 0x448   :  { %v465_v43 = vpop.permute.xlu2 %464 }
 0x449   :  { %v367_v0 = vpop.permute.xlu1 %366  ;;  %v365_v1 = vpop.permute.xlu0 %364 }
 0x44a   :  { %v369_v6 = vsel %vm368_vm0, %v365_v1, %v367_v0 }
 0x44b   :  { %371 = vst [vmem:[#allocation3 + $0x2] sm:$0x1] %v369_v6 }
 0x450   :  { %v478_v52 = vpop.permute.xlu2 %477 }
 0x451   :  { %v388_v11 = vpop.permute.xlu1 %387  ;;  %v379_v12 = vpop.permute.xlu0 %378 }
 0x452   :  { %v380_v13 = vsel %vm356_vm15, %v377_v3, %v379_v12 }
 0x453   :  { %382 = vst [vmem:[#allocation3 + $0x3] sm:$0x1] %v380_v13 }
 0x458   :  { %v498_v57 = vpop.permute.xlu2 %497 }
 0x459   :  { %v399_v17 = vpop.permute.xlu1 %398  ;;  %v390_v18 = vpop.permute.xlu0 %389 }
 0x45a   :  { %v391_v19 = vsel %vm368_vm0, %v388_v11, %v390_v18 }
 0x45b   :  { %393 = vst [vmem:[#allocation3 + $0x4] sm:$0x1] %v391_v19 }
 0x460   :  { %v511_v61 = vpop.permute.xlu2 %510 }
 0x461   :  { %v410_v24 = vpop.permute.xlu1 %409  ;;  %v401_v26 = vpop.permute.xlu0 %400 }
 0x462   :  { %v413_v25 = vsel %vm368_vm0, %v410_v24, %v412_v16  ;;  %v402_v27 = vsel %vm356_vm15, %v399_v17, %v401_v26 }
 0x463   :  { %415 = vst [vmem:[#allocation3 + $0x6] sm:$0x1] %v413_v25 }
 0x464   :  { %404 = vst [vmem:[#allocation3 + $0x5] sm:$0x1] %v402_v27 }
 0x469   :  { %v423_v33 = vpop.permute.xlu1 %422  ;;  %v421_v34 = vpop.permute.xlu0 %420 }
 0x46a   :  { %v424_v35 = vsel %vm356_vm15, %v421_v34, %v423_v33 }
 0x46b   :  { %426 = vst [vmem:[#allocation3 + $0x7] sm:$0x1] %v424_v35 }
 0x471   :  { %v443_v40 = vpop.permute.xlu1 %442  ;;  %v434_v42 = vpop.permute.xlu0 %433 }
 0x472   :  { %v446_v41 = vsel %vm356_vm15, %v443_v40, %v445_v32  ;;  %v435_v44 = vsel %vm368_vm0, %v432_v23, %v434_v42  ;;  %v515_v45 = vld [vmem:[#allocation3] sm:$0xff] }
 0x473   :  { %448 = vst [vmem:[#allocation3 + $0x9] sm:$0x1] %v446_v41  ;;  %549 = vmatmul.f32.vlgmr.msra.gmra.mxu0 %v515_v45 }
 0x474   :  { %437 = vst [vmem:[#allocation3 + $0x8] sm:$0x1] %v435_v44 }
 0x479   :  { %v456_v48 = vpop.permute.xlu1 %455  ;;  %v454_v49 = vpop.permute.xlu0 %453 }
 0x47a   :  { %v457_v51 = vsel %vm368_vm0, %v454_v49, %v456_v48 }
 0x47b   :  { %459 = vst [vmem:[#allocation3 + $0xa] sm:$0x1] %v457_v51 }
 0x481   :  { %v476_v53 = vpop.permute.xlu1 %475  ;;  %v467_v14 = vpop.permute.xlu0 %466 }
 0x482   :  { %v479_v54 = vsel %vm368_vm0, %v476_v53, %v478_v52  ;;  %v468_v55 = vsel %vm356_vm15, %v465_v43, %v467_v14 }
 0x483   :  { %481 = vst [vmem:[#allocation3 + $0xc] sm:$0x1] %v479_v54 }
 0x484   :  { %470 = vst [vmem:[#allocation3 + $0xb] sm:$0x1] %v468_v55 }
 0x489   :  { %v489_v58 = vpop.permute.xlu1 %488  ;;  %v487_v59 = vpop.permute.xlu0 %486 }
 0x48a   :  { %v490_v60 = vsel %vm356_vm15, %v487_v59, %v489_v58 }
 0x48b   :  { %492 = vst [vmem:[#allocation3 + $0xd] sm:$0x1] %v490_v60 }
 0x491   :  { %v509_v62 = vpop.permute.xlu1 %508  ;;  %v500_v1 = vpop.permute.xlu0 %499 }
 0x492   :  { %v512_v0 = vsel %vm356_vm15, %v509_v62, %v511_v61  ;;  %v501_v3 = vsel %vm368_vm0, %v498_v57, %v500_v1 }
 0x493   :  { %514 = vst [vmem:[#allocation3 + $0xf] sm:$0x1] %v512_v0 }
 0x494   :  { %503 = vst [vmem:[#allocation3 + $0xe] sm:$0x1] %v501_v3 }
 0x49b   :  { %v516_v6 = vld [vmem:[#allocation3 + $0x8] sm:$0xff] }
 0x49c   :  { %552 = vmatmul.f32.vlgmr.msra.gmra.mxu2 %v516_v6  ;;  %598 = vmatmul.f32.vlgmr.msra.gmra.mxu3 %v516_v6 }
 0x4f0   :  { %v550_v8 = vpop.f32.mrf.mxu0 }
 0x4f1   :  { %v561_v9 = vsel %vm559_vm1, %v550_v8, %v515_v45 }
 0x4f2   :  { %595 = vmatmul.f32.vlgmr.msra.gmra.mxu1 %v561_v9 }
 0x51f   :  { %v553_v10 = vpop.f32.mrf.mxu2  ;;  %v599_v11 = vpop.f32.mrf.mxu3 }
 0x520   :  { %v603_v12 = vmul.f32 %v599_v11, %v599_v11 }
 0x522   :  { %608 = vrot.lane.b32.xlu1 %v603_v12, %s997_s13 }
 0x56f   :  { %v596_v13 = vpop.f32.mrf.mxu1 }
 0x570   :  { %v602_v15 = vmul.f32 %v596_v13, %v596_v13 }
 0x572   :  { %606 = vrot.lane.b32.xlu0 %v602_v15, %s997_s13 }
 0x594   :  { %v609_v16 = vpop.permute.xlu1 %608 }
 0x595   :  { %v613_v17 = vadd.f32 %v609_v16, %v603_v12 }
 0x597   :  { %842 = vlog2.f32 %v613_v17  ;;  %v616_v20 = vsel %vm614_vm2, %v613_v17, 0.0 }
 0x59d   :  { %v843_v22 = vpop.eup %842 }
 0x59e   :  { %v678_v23 = vmul.f32 0.6931472, %v843_v22 }
 0x5a0   :  { %v680_v27 = vsel %vm614_vm2, %v678_v23, 0.0 }
 0x5e4   :  { %v607_v18 = vpop.permute.xlu0 %606 }
 0x5e5   :  { %v612_v56 = vadd.f32 %v607_v18, %v602_v15 }
 0x5e7   :  { %844 = vlog2.f32 %v612_v56  ;;  %v615_v19 = vsel %vm614_vm2, %v612_v56, 0.0 }
 0x5e8   :  { %v617_v21 = vadd.f32 %v616_v20, %v615_v19 }
 0x5ea   :  { %618 = vadd.xlane.f32.xlu2 %v617_v21 }
 0x5ed   :  { %v845_v24 = vpop.eup %844 }
 0x5ee   :  { %v676_v25 = vmul.f32 0.6931472, %v845_v24 }
 0x5f0   :  { %v679_v26 = vsel %vm614_vm2, %v676_v25, 0.0 }
 0x5f1   :  { %v681_v28 = vadd.f32 %v680_v27, %v679_v26 }
 0x5f3   :  { %682 = vadd.xlane.f32.xlu1 %v681_v28 }
 0x65d   :  { %v619_v29 = vpop.xlane.xlu2 %618 }
 0x65e   :  { %v620_v30 = vrot.slane %v619_v29, 4 }
 0x660   :  { %v621_v31 = vadd.f32 %v620_v30, %v619_v29 }
 0x662   :  { %v622_v32 = vrot.slane %v621_v31, 2 }
 0x664   :  { %v623_v33 = vadd.f32 %v622_v32, %v621_v31 }
 0x666   :  { %v624_v34 = vrot.slane %v623_v33, 1  ;;  %v683_v45 = vpop.xlane.xlu1 %682 }
 0x667   :  { %v684_v46 = vrot.slane %v683_v45, 4 }
 0x668   :  { %v625_v35 = vadd.f32 %v624_v34, %v623_v33 }
 0x669   :  { %v685_v47 = vadd.f32 %v684_v46, %v683_v45 }
 0x66a   :  { %811 = vpush %v625_v35 }
 0x66b   :  { %v686_v4 = vrot.slane %v685_v47, 2 }
 0x66d   :  { %v687_v50 = vadd.f32 %v686_v4, %v685_v47 }
 0x66f   :  { %v688_v53 = vrot.slane %v687_v50, 1 }
 0x671   :  { %v689_v55 = vadd.f32 %v688_v53, %v687_v50 }
 0x69b   :  { %s812_s14 = spop %811 }
 0x69c   :  { %v627_v36 = vstv %s812_s14 }
 0x69d   :  { %v628_v37 = vmul.f32 %v627_v36, %v1082_v63 }
 0x69f   :  { %v1183_v38 = vsub.f32 %v612_v56, %v628_v37  ;;  %v1185_v39 = vsub.f32 %v613_v17, %v628_v37 }
 0x6a1   :  { %v631_v40 = vmul.f32 %v1183_v38, %v1183_v38  ;;  %v632_v41 = vmul.f32 %v1185_v39, %v1185_v39 }
 0x6a3   :  { %v633_v42 = vsel %vm614_vm2, %v631_v40, 0.0  ;;  %v634_v43 = vsel %vm614_vm2, %v632_v41, 0.0 }
 0x6a4   :  { %v635_v44 = vadd.f32 %v634_v43, %v633_v42 }
 0x6a6   :  { %636 = vadd.xlane.f32.xlu0 %v635_v44 }
 0x719   :  { %v637_v5 = vpop.xlane.xlu0 %636 }
 0x71a   :  { %v638_v48 = vrot.slane %v637_v5, 4 }
 0x71c   :  { %v639_v49 = vadd.f32 %v638_v48, %v637_v5 }
 0x71e   :  { %v640_v51 = vrot.slane %v639_v49, 2 }
 0x720   :  { %v641_v52 = vadd.f32 %v640_v51, %v639_v49 }
 0x722   :  { %v642_v54 = vrot.slane %v641_v52, 1 }
 0x724   :  { %v643_v14 = vadd.f32 %v642_v54, %v641_v52 }
 0x726   :  { %813 = vpush %v643_v14 }
 0x727   :  { %815 = vpush %v689_v55 }
 0x757   :  { %s1193_s15 = spop %813 }
 0x758   :  { %s816_s16 = spop %815  ;;  %v645_v36 = vstv %s1193_s15 }
 0x759   :  { %v691_v57 = vstv %s816_s16  ;;  %v646_v37 = vmul.f32 %v645_v36, %v1113_v2 }
 0x75a   :  { %v692_v58 = vmul.f32 %v691_v57, %v1082_v63 }
 0x75b   :  { %vm654_vm9 = vcmp.eq.f32.partialorder %v646_v37, inf  ;;  %v657_v4 = vand.u32 2147483648, %v646_v37  ;;  %vm656_vm10 = vcmp.eq.f32.partialorder %v646_v37, 0.0 }
 0x75c   :  { %v693_v59 = vsub.f32 %v676_v25, %v692_v58  ;;  %v694_v60 = vsub.f32 %v678_v23, %v692_v58 }
 0x75e   :  { %v695_v61 = vmul.f32 %v693_v59, %v693_v59  ;;  %v696_v62 = vmul.f32 %v694_v60, %v694_v60 }
 0x760   :  { %v697_v0 = vsel %vm614_vm2, %v695_v61, 0.0  ;;  %v698_v1 = vsel %vm614_vm2, %v696_v62, 0.0 }
 0x761   :  { %v699_v3 = vadd.f32 %v698_v1, %v697_v0 }
 0x763   :  { %700 = vadd.xlane.f32.xlu2 %v699_v3 }
 0x7d6   :  { %v701_v6 = vpop.xlane.xlu2 %700 }
 0x7d7   :  { %v702_v7 = vrot.slane %v701_v6, 4 }
 0x7d9   :  { %v703_v8 = vadd.f32 %v702_v7, %v701_v6 }
 0x7db   :  { %v704_v9 = vrot.slane %v703_v8, 2 }
 0x7dd   :  { %v705_v10 = vadd.f32 %v704_v9, %v703_v8 }
 0x7df   :  { %v706_v11 = vrot.slane %v705_v10, 1 }
 0x7e1   :  { %v707_v12 = vadd.f32 %v706_v11, %v705_v10 }
 0x7e3   :  { %817 = vpush %v707_v12 }
 0x814   :  { %s818_s17 = spop %817 }
 0x815   :  { %v709_v63 = vstv %s818_s17 }
 0x816   :  { %v710_v13 = vmul.f32 %v709_v63, %v1113_v2 }
 0x818   :  { %846 = vrsqrt.f32 %v710_v13  ;;  %vm718_vm3 = vcmp.eq.f32.partialorder %v710_v13, inf  ;;  %v721_v21 = vand.u32 2147483648, %v710_v13  ;;  %vm720_vm4 = vcmp.eq.f32.partialorder %v710_v13, 0.0 }
 0x81e   :  { %v847_v15 = vpop.eup %846 }
 0x81f   :  { %v712_v16 = vmul.f32 %v847_v15, %v710_v13 }
 0x821   :  { %v713_v17 = vmul.f32 %v847_v15, %v712_v16 }
 0x823   :  { %v714_v18 = vmul.f32 0.5, %v713_v17 }
 0x825   :  { %v715_v56 = vsub.f32 1.5, %v714_v18 }
 0x827   :  { %v716_v19 = vmul.f32 %v847_v15, %v715_v56 }
 0x829   :  { %v717_v20 = vmul.f32 %v716_v19, %v710_v13 }
 0x82b   :  { %v719_v22 = vsel %vm718_vm3, %v710_v13, %v717_v20 }
 0x82c   :  { %v722_v23 = vsel %vm720_vm4, %v721_v21, %v719_v22 }
 0x82d   :  { %848 = vrcp.f32 %v722_v23  ;;  %v734_v27 = vand.u32 2147483648, %v722_v23  ;;  %v732_v29 = vand.u32 2147483647, %v722_v23  ;;  %vm728_vm6 = vweird.f32 %v722_v23 }
 0x82e   :  { %850 = vrsqrt.f32 %v646_v37 }
 0x82f   :  { %v735_v31 = vor.u32 1.1754944e-38, %v734_v27  ;;  %vm733_vm8 = vcmp.eq.f32.partialorder %v732_v29, 8.507059e+37 }
 0x833   :  { %v849_v24 = vpop.eup %848 }
 0x834   :  { %v724_v25 = vmul.f32 %v849_v24, %v722_v23  ;;  %vm729_vm5 = vweird.f32 %v849_v24  ;;  %v851_v40 = vpop.eup %850 }
 0x835   :  { %vm730_vm7 = vmor %vm728_vm6, %vm729_vm5  ;;  %v648_v41 = vmul.f32 %v851_v40, %v646_v37 }
 0x836   :  { %v725_v26 = vsub.f32 1.0, %v724_v25 }
 0x837   :  { %v649_v42 = vmul.f32 %v851_v40, %v648_v41 }
 0x838   :  { %v726_v28 = vmul.f32 %v849_v24, %v725_v26 }
 0x839   :  { %v650_v43 = vmul.f32 0.5, %v649_v42 }
 0x83a   :  { %v727_v30 = vadd.f32 %v849_v24, %v726_v28 }
 0x83b   :  { %v651_v44 = vsub.f32 1.5, %v650_v43 }
 0x83c   :  { %v731_v32 = vsel %vm730_vm7, %v849_v24, %v727_v30 }
 0x83d   :  { %v736_v33 = vsel %vm733_vm8, %v735_v31, %v731_v32  ;;  %v652_v45 = vmul.f32 %v851_v40, %v651_v44 }
 0x83e   :  { %v738_v34 = vmul.f32 %v736_v33, %v694_v60  ;;  %v737_v35 = vmul.f32 %v736_v33, %v693_v59 }
 0x83f   :  { %v653_v46 = vmul.f32 %v652_v45, %v646_v37 }
 0x840   :  { %743 = vrot.lane.b32.xlu1 %v738_v34, %s997_s13  ;;  %741 = vrot.lane.b32.xlu0 %v737_v35, %s997_s13 }
 0x841   :  { %v655_v47 = vsel %vm654_vm9, %v646_v37, %v653_v46 }
 0x842   :  { %v658_v5 = vsel %vm656_vm10, %v657_v4, %v655_v47 }
 0x843   :  { %852 = vrcp.f32 %v658_v5  ;;  %v670_v2 = vand.u32 2147483648, %v658_v5  ;;  %vm664_vm12 = vweird.f32 %v658_v5  ;;  %v668_v53 = vand.u32 2147483647, %v658_v5 }
 0x845   :  { %v671_v14 = vor.u32 1.1754944e-38, %v670_v2  ;;  %vm669_vm14 = vcmp.eq.f32.partialorder %v668_v53, 8.507059e+37 }
 0x849   :  { %v853_v48 = vpop.eup %852 }
 0x84a   :  { %v660_v49 = vmul.f32 %v853_v48, %v658_v5  ;;  %vm665_vm11 = vweird.f32 %v853_v48 }
 0x84b   :  { %vm666_vm13 = vmor %vm664_vm12, %vm665_vm11 }
 0x84c   :  { %v661_v50 = vsub.f32 1.0, %v660_v49 }
 0x84e   :  { %v662_v51 = vmul.f32 %v853_v48, %v661_v50 }
 0x850   :  { %v663_v52 = vadd.f32 %v853_v48, %v662_v51 }
 0x852   :  { %v667_v54 = vsel %vm666_vm13, %v853_v48, %v663_v52 }
 0x853   :  { %v672_v55 = vsel %vm669_vm14, %v671_v14, %v667_v54 }
 0x854   :  { %v674_v57 = vmul.f32 %v672_v55, %v1185_v39  ;;  %v673_v58 = vmul.f32 %v672_v55, %v1183_v38 }
 0x8b2   :  { %v744_v59 = vpop.permute.xlu1 %743  ;;  %v742_v60 = vpop.permute.xlu0 %741 }
 0x8b3   :  { %v748_v61 = vsel %vm614_vm2, %v674_v57, %v744_v59  ;;  %v747_v62 = vsel %vm614_vm2, %v673_v58, %v742_v60 }
 0x8b4   :  { %750 = vst [vmem:[#allocation12 + $0x8] sm:$0xff] %v748_v61 }
 0x8b5   :  { %749 = vst [vmem:[#allocation12] sm:$0xff] %v747_v62 }
 0x8b6   :  { %763 = dma.vmem_to_hbm [thread:$0]  %s756_s19, 256, %s758_s22, [#allocation6], %s985_s6, %s985_s6, %s986_s0  }
 0x8b7   :  { %980 = dma.done.wait [#allocation6], 256  }
 0x8b8   :  { %981 = vsyncadd [#allocation6], 4294967040 }
 0x8b9   :  { %768 = vsyncpa [#allocation5], 1 }
 0x8ba   :  { %769 = vsyncpa [#allocation8], 1 }
 0x8bb   :  { %770 = vsyncpa [#allocation11], 1 }
 0x8bc   :  { %771 = vsyncpa [#allocation6], 1 }

</bundles_post_ra>
